<compile_context>
chip_gen: v7x
topology: tpu7x:2x2x1
jax: 0.10.0
libtpu: 0.0.40
codegen_flags: <defaults>
</compile_context>

<pallas_src>
import functools

import jax
import jax.numpy as jnp
from jax.experimental import pallas as pl
from jax.experimental.pallas import tpu as pltpu


def _round_up(n, m):
    return ((n + m - 1) // m) * m


def _dqn_kernel(x_ref, p_ref, o_ref, *, din, hid, act):
    """One batch tile: relu(x@W1+b1) -> (dropout=id) -> relu(.@W2+b2) -> .@W3+b3.

    p_ref is the packed parameter slab, laid out (rows x width):
      [0        , din      ) : W1   (padded (din, hid))
      [din      , din+hid  ) : W2   (padded (hid, hid))
      [din+hid  , din+2*hid) : W3   (padded (hid, act))
      [din+2*hid, +8)        : b1 in row 0
      [.. +8    , +8)        : b2 in row 0
      [.. +16   , +8)        : b3 in row 0
    All offsets are multiples of 8 rows / 128 cols, so every slice below is
    (8,128)-tile aligned.
    """
    r_w2 = din
    r_w3 = din + hid
    r_b1 = din + 2 * hid
    r_b2 = r_b1 + 8
    r_b3 = r_b2 + 8

    x = x_ref[...]

    # Layer 1: relu(x @ W1 + b1)   -- f32 accumulation on the MXU.
    w1 = p_ref[0:din, 0:hid]
    b1 = p_ref[r_b1:r_b1 + 1, 0:hid]
    h1 = jnp.dot(x, w1, preferred_element_type=jnp.float32)
    h1 = jnp.maximum(h1 + b1, 0.0)

    # Dropout: identity at inference time (eval mode).

    # Layer 2: relu(h1 @ W2 + b2)
    w2 = p_ref[r_w2:r_w2 + hid, 0:hid]
    b2 = p_ref[r_b2:r_b2 + 1, 0:hid]
    h2 = jnp.dot(h1.astype(w2.dtype), w2, preferred_element_type=jnp.float32)
    h2 = jnp.maximum(h2 + b2, 0.0)

    # Output layer: h2 @ W3 + b3 (no activation)
    w3 = p_ref[r_w3:r_w3 + hid, 0:act]
    b3 = p_ref[r_b3:r_b3 + 1, 0:act]
    out = jnp.dot(h2.astype(w3.dtype), w3, preferred_element_type=jnp.float32)
    o_ref[...] = (out + b3).astype(o_ref.dtype)


def pack_dqn_params(params, compute_dtype=jnp.float32):
    """Pack w1,b1,w2,b2,w3,b3 into one zero-padded (rows, width) slab.

    Padded columns/rows are zero, so the padded lanes of every intermediate
    activation stay exactly zero and the math matches the unpadded network.
    Returns (slab, (din, hid, act)) where the dims are the padded sizes.
    """
    w1, b1 = params["w1"], params["b1"]
    w2, b2 = params["w2"], params["b2"]
    w3, b3 = params["w3"], params["b3"]
    n_obs, hidden = w1.shape
    n_act = w3.shape[1]

    din = _round_up(n_obs, 128)
    hid = _round_up(hidden, 128)
    act = _round_up(n_act, 128)
    width = max(hid, act)
    rows = din + 2 * hid + 3 * 8  # three 8-row bias blocks

    slab = jnp.zeros((rows, width), compute_dtype)
    slab = slab.at[0:n_obs, 0:hidden].set(w1.astype(compute_dtype))
    slab = slab.at[din:din + hidden, 0:hidden].set(w2.astype(compute_dtype))
    slab = slab.at[din + hid:din + hid + hidden, 0:n_act].set(
        w3.astype(compute_dtype))
    r_b1 = din + 2 * hid
    slab = slab.at[r_b1, 0:hidden].set(b1.reshape(-1).astype(compute_dtype))
    slab = slab.at[r_b1 + 8, 0:hidden].set(b2.reshape(-1).astype(compute_dtype))
    slab = slab.at[r_b1 + 16, 0:n_act].set(b3.reshape(-1).astype(compute_dtype))
    return slab, (din, hid, act)


def dqn_forward(x, params, *, compute_dtype=jnp.float32, max_batch_tile=512):
    """DQN forward pass as one Pallas kernel.

    x: (B, n_observations) float32
    params: dict with w1 (n_obs, H), b1 (1, H), w2 (H, H), b2 (1, H),
            w3 (H, A), b3 (1, A)  (weights stored as (in, out), i.e. PyTorch
            weights transposed, so the kernel computes plain x @ W + b).
    compute_dtype: jnp.float32 (exact) or jnp.bfloat16 (native MXU rate,
            half the weight bytes; accumulation is always f32).
    """
    B, n_obs = x.shape
    n_act = params["w3"].shape[1]

    slab, (din, hid, act) = pack_dqn_params(params, compute_dtype)

    # Batch tiling: pad to 8 sublanes; tile at most `max_batch_tile` rows per
    # grid step; "parallel" semantics shards big batches across v7x's 2 TCs.
    b8 = _round_up(B, 8)
    tb = min(b8, max_batch_tile)
    bp = _round_up(b8, tb)

    x_p = jnp.zeros((bp, din), compute_dtype)
    x_p = x_p.at[:B, :n_obs].set(x.astype(compute_dtype))

    kernel = functools.partial(_dqn_kernel, din=din, hid=hid, act=act)

    itemsize = jnp.dtype(compute_dtype).itemsize
    # Double-buffered x/out tiles + resident weight slab + headroom.
    vmem_bytes = (2 * tb * (din * itemsize + act * 4)
                  + 2 * slab.size * itemsize + (2 << 20))
    vmem_limit = int(min(max(vmem_bytes, 16 << 20), 64 << 20))

    out_p = pl.pallas_call(
        kernel,
        out_shape=jax.ShapeDtypeStruct((bp, act), jnp.float32),
        grid_spec=pltpu.PrefetchScalarGridSpec(
            num_scalar_prefetch=0,
            grid=(bp // tb,),
            in_specs=[
                pl.BlockSpec((tb, din), lambda i: (i, 0)),
                # Whole parameter slab: one DMA, constant index -> stays
                # resident in VMEM across all batch tiles.
                pl.BlockSpec(slab.shape, lambda i: (0, 0)),
            ],
            out_specs=pl.BlockSpec((tb, act), lambda i: (i, 0)),
        ),
        compiler_params=pltpu.CompilerParams(
            dimension_semantics=("parallel",),
            vmem_limit_bytes=vmem_limit,
        ),
    )(x_p, slab)

    # Strip batch / action padding.
    return out_p[:B, :n_act]


def init_params(key, n_observations, hidden_size, n_actions):
    """Deterministic init mimicking nn.Linear (uniform +/- 1/sqrt(fan_in))."""
    def linear(k, fan_in, fan_out):
        kw, kb = jax.random.split(k)
        bound = 1.0 / jnp.sqrt(fan_in)
        w = jax.random.uniform(kw, (fan_in, fan_out), jnp.float32, -bound, bound)
        b = jax.random.uniform(kb, (1, fan_out), jnp.float32, -bound, bound)
        return w, b

    k1, k2, k3 = jax.random.split(key, 3)
    w1, b1 = linear(k1, n_observations, hidden_size)
    w2, b2 = linear(k2, hidden_size, hidden_size)
    w3, b3 = linear(k3, hidden_size, n_actions)
    return {"w1": w1, "b1": b1, "w2": w2, "b2": b2, "w3": w3, "b3": b3}


def dqn_reference(x, params):
    h1 = jnp.maximum(x @ params["w1"] + params["b1"], 0.0)
    h2 = jnp.maximum(h1 @ params["w2"] + params["b2"], 0.0)
    return h2 @ params["w3"] + params["b3"]


if __name__ == "__main__":
    batch = 2
    n_observations = 8
    hidden_size = 32
    n_actions = 4

    key = jax.random.PRNGKey(0)
    kx, kp = jax.random.split(key)
    x = jax.random.normal(kx, (batch, n_observations), jnp.float32)
    params = init_params(kp, n_observations, hidden_size, n_actions)

    ref = dqn_reference(x, params)

    # Exact f32 path.
    out = jax.block_until_ready(dqn_forward(x, params))
    assert out.shape == (batch, n_actions)
    assert jnp.allclose(out, ref, atol=1e-5, rtol=1e-5)

    # bf16-weights path (recommended once the network is scaled up):
    # native MXU rate with f32 accumulation; loose tolerance for bf16 rounding.
    out_bf16 = jax.block_until_ready(
        dqn_forward(x, params, compute_dtype=jnp.bfloat16))
    assert out_bf16.shape == (batch, n_actions)
    assert jnp.allclose(out_bf16, ref, atol=1e-1, rtol=1e-1)

    print("KERNEL_OK")
</pallas_src>

<mosaic_0001>
module attributes {stable_mosaic.version = 11 : i64} {
  func.func @_dqn_kernel(%arg0: i32, %arg1: memref<8x128xf32, #tpu.memory_space<vmem>>, %arg2: memref<408x128xf32, #tpu.memory_space<vmem>>, %arg3: memref<8x128xf32, #tpu.memory_space<vmem>>) attributes {dimension_semantics = [#tpu.dimension_semantics<parallel>], iteration_bounds = array<i64: 1>, scalar_prefetch = 0 : i64, scratch_operands = 0 : i64, tpu.core_type = #tpu.core_type<tc>, window_params = [{transform_indices = @transform_0, window_bounds = array<i64: 8, 128>}, {pipeline_mode = #tpu.pipeline_mode<synchronous>, transform_indices = @transform_1, window_bounds = array<i64: 408, 128>}, {transform_indices = @transform_2, window_bounds = array<i64: 8, 128>}]} {
    %c0 = arith.constant 0 : index
    %c0_0 = arith.constant 0 : index
    %0 = vector.load %arg1[%c0, %c0_0] : memref<8x128xf32, #tpu.memory_space<vmem>>, vector<8x128xf32>
    %c0_1 = arith.constant 0 : index
    %c0_2 = arith.constant 0 : index
    %1 = vector.load %arg2[%c0_1, %c0_2] : memref<408x128xf32, #tpu.memory_space<vmem>>, vector<128x128xf32>
    %c384 = arith.constant 384 : index
    %c0_3 = arith.constant 0 : index
    %2 = vector.load %arg2[%c384, %c0_3] : memref<408x128xf32, #tpu.memory_space<vmem>>, vector<1x128xf32>
    %cst = arith.constant dense<0.000000e+00> : vector<8x128xf32>
    %3 = tpu.matmul %0, %1, %cst {dimension_numbers = #tpu.dot_dimension_numbers<[1], [0], [0], [1], [0, 0, 1, 1], [], []>} : vector<8x128xf32>, vector<128x128xf32>, vector<8x128xf32> -> vector<8x128xf32>
    %4 = vector.broadcast %2 : vector<1x128xf32> to vector<8x128xf32>
    %5 = arith.addf %3, %4 : vector<8x128xf32>
    %cst_4 = arith.constant 0.000000e+00 : f32
    %6 = vector.broadcast %cst_4 : f32 to vector<8x128xf32>
    %7 = arith.maximumf %5, %6 : vector<8x128xf32>
    %c128 = arith.constant 128 : index
    %c0_5 = arith.constant 0 : index
    %8 = vector.load %arg2[%c128, %c0_5] : memref<408x128xf32, #tpu.memory_space<vmem>>, vector<128x128xf32>
    %c392 = arith.constant 392 : index
    %c0_6 = arith.constant 0 : index
    %9 = vector.load %arg2[%c392, %c0_6] : memref<408x128xf32, #tpu.memory_space<vmem>>, vector<1x128xf32>
    %cst_7 = arith.constant dense<0.000000e+00> : vector<8x128xf32>
    %10 = tpu.matmul %7, %8, %cst_7 {dimension_numbers = #tpu.dot_dimension_numbers<[1], [0], [0], [1], [0, 0, 1, 1], [], []>} : vector<8x128xf32>, vector<128x128xf32>, vector<8x128xf32> -> vector<8x128xf32>
    %11 = vector.broadcast %9 : vector<1x128xf32> to vector<8x128xf32>
    %12 = arith.addf %10, %11 : vector<8x128xf32>
    %cst_8 = arith.constant 0.000000e+00 : f32
    %13 = vector.broadcast %cst_8 : f32 to vector<8x128xf32>
    %14 = arith.maximumf %12, %13 : vector<8x128xf32>
    %c256 = arith.constant 256 : index
    %c0_9 = arith.constant 0 : index
    %15 = vector.load %arg2[%c256, %c0_9] : memref<408x128xf32, #tpu.memory_space<vmem>>, vector<128x128xf32>
    %c400 = arith.constant 400 : index
    %c0_10 = arith.constant 0 : index
    %16 = vector.load %arg2[%c400, %c0_10] : memref<408x128xf32, #tpu.memory_space<vmem>>, vector<1x128xf32>
    %cst_11 = arith.constant dense<0.000000e+00> : vector<8x128xf32>
    %17 = tpu.matmul %14, %15, %cst_11 {dimension_numbers = #tpu.dot_dimension_numbers<[1], [0], [0], [1], [0, 0, 1, 1], [], []>} : vector<8x128xf32>, vector<128x128xf32>, vector<8x128xf32> -> vector<8x128xf32>
    %18 = vector.broadcast %16 : vector<1x128xf32> to vector<8x128xf32>
    %19 = arith.addf %17, %18 : vector<8x128xf32>
    %c0_12 = arith.constant 0 : index
    %c0_13 = arith.constant 0 : index
    %20 = vector.load %arg3[%c0_12, %c0_13] : memref<8x128xf32, #tpu.memory_space<vmem>>, vector<8x128xf32>
    tpu.vector_store %arg3[%c0_12, %c0_13], %19 {strides = array<i32>} : memref<8x128xf32, #tpu.memory_space<vmem>>, vector<8x128xf32>,
    return
  }
  func.func @transform_0(%arg0: i32) -> (i32, i32) {
    %c0_i32 = arith.constant 0 : i32
    %c0_i32_0 = arith.constant 0 : i32
    return %arg0, %c0_i32 : i32, i32
  }
  func.func @transform_1(%arg0: i32) -> (i32, i32) {
    %c0_i32 = arith.constant 0 : i32
    %c0_i32_0 = arith.constant 0 : i32
    %c0_i32_1 = arith.constant 0 : i32
    return %c0_i32, %c0_i32_0 : i32, i32
  }
  func.func @transform_2(%arg0: i32) -> (i32, i32) {
    %c0_i32 = arith.constant 0 : i32
    %c0_i32_0 = arith.constant 0 : i32
    return %arg0, %c0_i32 : i32, i32
  }
}

</mosaic_0001>

<bundles_post_ra>
// kernel: tpu_custom_call.1
= control target key start
LH: loop header
LB: loop body
LE: loop exit
PB: predicated region body
PF: predicated region fallthrough
CT: control target
= control target key end

     0   :  { %7 = vsyncpa [#allocation3], 0  ;;  %s738_s0 = inlined_call_operand.hbm [shape: f32[8,128], index: 0, kind: input, shape index: {}]   ;;  %s739_s1 = inlined_call_operand.hbm [shape: f32[408,128], index: 1, kind: input, shape index: {}]   ;;  %s740_s2 = inlined_call_operand.hbm [shape: f32[8,128], index: 2, kind: output, shape index: {}]  }
   0x1   :  { %8 = vsyncpa [#allocation6], 0 }
   0x2   :  { %9 = vsyncpa [#allocation4], 0  ;;  %s642_s9 = smov [#allocation2]   ;;  %s643_s11 = smov [#allocation5]  }
   0x3   :  { %s16_s10 = sshll.u32 %s642_s9, 4  ;;  %s25_s12 = sshll.u32 %s643_s11, 4  ;;  %s17_s10 = int_to_ptr.vmem [resolvable:$true] %s16_s10  ;;  %s665_s12 = int_to_ptr.vmem [resolvable:$true] %s25_s12 }
   0x4   :  { %s570_s15 = scalar_lea.hbm %s738_s0, 128 }
   0x5   :  { %p571_p0 = scmp.ne.s32.totalorder %s738_s0, %s570_s15  ;;  %p574_p1 = scmp.lt.u32.totalorder %s570_s15, %s738_s0 }
   0x7   :  { %p576_p2 = pnand %p574_p1, %p571_p0 }
   0x9   :  { %579 = shalt.err (!%p576_p2)
}
   0xa   :  { %s580_s20 = scalar_lea.vmem %s17_s10, 128  ;;  %p585_p4 = scmp.lt.s32.totalorder %s17_s10, %s17_s10 }
   0xb   :  { %p581_p3 = scmp.ne.s32.totalorder %s17_s10, %s580_s20  ;;  %p586_p5 = scmp.lt.s32.totalorder %s580_s20, %s580_s20 }
   0xd   :  { %p587_p6 = por %p586_p5, %p585_p4 }
   0xf   :  { %p588_p7 = pnand %p587_p6, %p581_p3 }
  0x11   :  { %591 = shalt.err (!%p588_p7)
}
  0x12   :  { %19 = dma.hbm_to_vmem [thread:$0]  %s738_s0, 128, %s17_s10, [#allocation3]  }
  0x13   :  { %s592_s25 = scalar_lea.hbm %s739_s1, 6528 }
  0x14   :  { %p593_p8 = scmp.ne.s32.totalorder %s739_s1, %s592_s25  ;;  %p596_p9 = scmp.lt.u32.totalorder %s592_s25, %s739_s1 }
  0x16   :  { %p598_p10 = pnand %p596_p9, %p593_p8 }
  0x18   :  { %601 = shalt.err (!%p598_p10)
}
  0x19   :  { %s602_s30 = scalar_lea.vmem %s665_s12, 6528  ;;  %p607_p12 = scmp.lt.s32.totalorder %s665_s12, %s665_s12 }
  0x1a   :  { %p603_p11 = scmp.ne.s32.totalorder %s665_s12, %s602_s30  ;;  %p608_p13 = scmp.lt.s32.totalorder %s602_s30, %s602_s30 }
  0x1c   :  { %p609_p0 = por %p608_p13, %p607_p12 }
  0x1e   :  { %p610_p1 = pnand %p609_p0, %p603_p11 }
  0x20   :  { %613 = shalt.err (!%p610_p1)
}
  0x21   :  { %s644_s0 = smov 128   ;;  %s645_s3 = smov 8  }
  0x22   :  { %31 = dma.hbm_to_vmem [thread:$0]  %s739_s1, 6528, %s665_s12, [#allocation6], %s644_s0, %s644_s0, %s645_s3  }
  0x23   :  { %636 = dma.done.wait [#allocation3], 128  }
  0x24   :  { %637 = vsyncadd [#allocation3], 4294967168 }
  0x25   :  { %638 = dma.done.wait [#allocation6], 6528  }
  0x26   :  { %639 = vsyncadd [#allocation6], 4294960768  ;;  %v646_v0 = vmov 0.0|0.0   ;;  %vm647_vm0 = vmmov 0   ;;  %v648_v1 = vmov 0.0   ;;  %v39_v2 = vld [vmem:[#allocation5] sm:$0xff] }
  0x27   :  { %490 = vmatprep.subr.bf16.mxu0 %v646_v0  ;;  %417 = vmatprep.mubr.msk.f32.mxu0 %vm647_vm0, %v648_v1  ;;  %v40_v3 = vld [vmem:[#allocation5 + $0x8] sm:$0xff]  ;;  %v41_v4 = vld [vmem:[#allocation5 + $0x10] sm:$0xff]  ;;  %v42_v6 = vld [vmem:[#allocation5 + $0x18] sm:$0xff]  ;;  %s649_s1 = smov [#allocation7]  }
  0x28   :  { %514 = vmatprep.subr.bf16.mxu1 %v646_v0  ;;  %452 = vmatprep.mubr.msk.f32.mxu1 %vm647_vm0, %v648_v1  ;;  %v491_v5 = vpack.c.bf16 %v40_v3, %v39_v2  ;;  %v494_v7 = vpack.c.bf16 %v42_v6, %v41_v4  ;;  %v43_v8 = vld [vmem:[#allocation5 + $0x20] sm:$0xff]  ;;  %v44_v9 = vld [vmem:[#allocation5 + $0x28] sm:$0xff]  ;;  %v133_v12 = vld [vmem:[#allocation5 + $0x90] sm:$0xff]  ;;  %s321_s6 = sshll.u32 %s649_s1, 4  ;;  %s322_s6 = int_to_ptr.vmem [resolvable:$true] %s321_s6 }
  0x29   :  { %v131_v10 = vld [vmem:[#allocation5 + $0x80] sm:$0xff]  ;;  %v132_v11 = vld [vmem:[#allocation5 + $0x88] sm:$0xff]  ;;  %v134_v13 = vld [vmem:[#allocation5 + $0x98] sm:$0xff]  ;;  %v497_v14 = vpack.c.bf16 %v44_v9, %v43_v8  ;;  %s614_s7 = scalar_lea.vmem %s322_s6, 128  ;;  %p619_p3 = scmp.lt.s32.totalorder %s322_s6, %s322_s6 }
  0x2a   :  { %492 = vmatpush3.bf16.msra.mxu0 %v491_v5  ;;  %v515_v15 = vpack.c.bf16 %v132_v11, %v131_v10  ;;  %v45_v16 = vld [vmem:[#allocation5 + $0x30] sm:$0xff]  ;;  %v46_v17 = vld [vmem:[#allocation5 + $0x38] sm:$0xff]  ;;  %v518_v18 = vpack.c.bf16 %v134_v13, %v133_v12  ;;  %v135_v19 = vld [vmem:[#allocation5 + $0xa0] sm:$0xff]  ;;  %p615_p2 = scmp.ne.s32.totalorder %s322_s6, %s614_s7  ;;  %p620_p4 = scmp.lt.s32.totalorder %s614_s7, %s614_s7 }
  0x2b   :  { %493 = vmatprep.subr.bf16.mxu0 %v646_v0  ;;  %v136_v20 = vld [vmem:[#allocation5 + $0xa8] sm:$0xff]  ;;  %v500_v21 = vpack.c.bf16 %v46_v17, %v45_v16  ;;  %v47_v22 = vld [vmem:[#allocation5 + $0x40] sm:$0xff]  ;;  %v137_v25 = vld [vmem:[#allocation5 + $0xb0] sm:$0xff] }
  0x2c   :  { %516 = vmatpush3.bf16.msra.mxu1 %v515_v15  ;;  %v48_v23 = vld [vmem:[#allocation5 + $0x48] sm:$0xff]  ;;  %v521_v24 = vpack.c.bf16 %v136_v20, %v135_v19  ;;  %v138_v26 = vld [vmem:[#allocation5 + $0xb8] sm:$0xff]  ;;  %v49_v28 = vld [vmem:[#allocation5 + $0x50] sm:$0xff]  ;;  %p621_p5 = por %p620_p4, %p619_p3 }
  0x2d   :  { %517 = vmatprep.subr.bf16.mxu1 %v646_v0  ;;  %v503_v27 = vpack.c.bf16 %v48_v23, %v47_v22  ;;  %v50_v29 = vld [vmem:[#allocation5 + $0x58] sm:$0xff]  ;;  %v524_v30 = vpack.c.bf16 %v138_v26, %v137_v25  ;;  %v139_v31 = vld [vmem:[#allocation5 + $0xc0] sm:$0xff]  ;;  %v140_v32 = vld [vmem:[#allocation5 + $0xc8] sm:$0xff] }
  0x2e   :  { %495 = vmatpush3.bf16.msra.mxu0 %v494_v7  ;;  %v506_v33 = vpack.c.bf16 %v50_v29, %v49_v28  ;;  %v51_v34 = vld [vmem:[#allocation5 + $0x60] sm:$0xff]  ;;  %v52_v35 = vld [vmem:[#allocation5 + $0x68] sm:$0xff]  ;;  %v527_v36 = vpack.c.bf16 %v140_v32, %v139_v31  ;;  %v141_v37 = vld [vmem:[#allocation5 + $0xd0] sm:$0xff]  ;;  %p622_p6 = pnand %p621_p5, %p615_p2 }
  0x2f   :  { %496 = vmatprep.subr.bf16.mxu0 %v646_v0  ;;  %v142_v38 = vld [vmem:[#allocation5 + $0xd8] sm:$0xff]  ;;  %v509_v39 = vpack.c.bf16 %v52_v35, %v51_v34  ;;  %v53_v40 = vld [vmem:[#allocation5 + $0x70] sm:$0xff]  ;;  %v143_v43 = vld [vmem:[#allocation5 + $0xe0] sm:$0xff] }
  0x30   :  { %519 = vmatpush3.bf16.msra.mxu1 %v518_v18  ;;  %v54_v41 = vld [vmem:[#allocation5 + $0x78] sm:$0xff]  ;;  %v530_v42 = vpack.c.bf16 %v142_v38, %v141_v37  ;;  %v144_v44 = vld [vmem:[#allocation5 + $0xe8] sm:$0xff]  ;;  %v145_v48 = vld [vmem:[#allocation5 + $0xf0] sm:$0xff] }
  0x31   :  { %520 = vmatprep.subr.bf16.mxu1 %v646_v0  ;;  %v512_v45 = vpack.c.bf16 %v54_v41, %v53_v40  ;;  %v533_v46 = vpack.c.bf16 %v144_v44, %v143_v43  ;;  %v38_v47 = vld [vmem:[#allocation2] sm:$0xff]  ;;  %v223_v51 = vld [vmem:[#allocation5 + $0x100] sm:$0xff]  ;;  %v224_v52 = vld [vmem:[#allocation5 + $0x108] sm:$0xff] }
  0x32   :  { %498 = vmatpush3.bf16.msra.mxu0 %v497_v14  ;;  %v146_v49 = vld [vmem:[#allocation5 + $0xf8] sm:$0xff]  ;;  %v225_v53 = vld [vmem:[#allocation5 + $0x110] sm:$0xff]  ;;  %v539_v54 = vpack.c.bf16 %v224_v52, %v223_v51  ;;  %v227_v57 = vld [vmem:[#allocation5 + $0x120] sm:$0xff] }
  0x33   :  { %499 = vmatprep.subr.bf16.mxu0 %v646_v0  ;;  %v536_v50 = vpack.c.bf16 %v146_v49, %v145_v48  ;;  %v226_v55 = vld [vmem:[#allocation5 + $0x118] sm:$0xff]  ;;  %v228_v58 = vld [vmem:[#allocation5 + $0x128] sm:$0xff]  ;;  %v229_v60 = vld [vmem:[#allocation5 + $0x130] sm:$0xff] }
  0x34   :  { %522 = vmatpush3.bf16.msra.mxu1 %v521_v24  ;;  %v542_v56 = vpack.c.bf16 %v226_v55, %v225_v53  ;;  %v545_v59 = vpack.c.bf16 %v228_v58, %v227_v57  ;;  %v230_v61 = vld [vmem:[#allocation5 + $0x138] sm:$0xff]  ;;  %v231_v63 = vld [vmem:[#allocation5 + $0x140] sm:$0xff]  ;;  %v233_v3 = vld [vmem:[#allocation5 + $0x150] sm:$0xff] }
  0x35   :  { %523 = vmatprep.subr.bf16.mxu1 %v646_v0  ;;  %v548_v62 = vpack.c.bf16 %v230_v61, %v229_v60  ;;  %v234_v4 = vld [vmem:[#allocation5 + $0x158] sm:$0xff]  ;;  %v235_v6 = vld [vmem:[#allocation5 + $0x160] sm:$0xff]  ;;  %v236_v7 = vld [vmem:[#allocation5 + $0x168] sm:$0xff] }
  0x36   :  { %501 = vmatpush3.bf16.msra.mxu0 %v500_v21  ;;  %v554_v5 = vpack.c.bf16 %v234_v4, %v233_v3  ;;  %v557_v8 = vpack.c.bf16 %v236_v7, %v235_v6  ;;  %v331_v9 = vld [vmem:[#allocation5 + $0x180] ss:$0 sm:$0xff]  ;;  %v237_v14 = vld [vmem:[#allocation5 + $0x170] sm:$0xff]  ;;  %v238_v15 = vld [vmem:[#allocation5 + $0x178] sm:$0xff] }
  0x37   :  { %502 = vmatprep.subr.bf16.mxu0 %v646_v0  ;;  %v560_v16 = vpack.c.bf16 %v238_v15, %v237_v14  ;;  %v332_v17 = vld [vmem:[#allocation5 + $0x188] ss:$0 sm:$0xff]  ;;  %v333_v22 = vld [vmem:[#allocation5 + $0x190] ss:$0 sm:$0xff] }
  0x38   :  { %525 = vmatpush3.bf16.msra.mxu1 %v524_v30 }
  0x39   :  { %526 = vmatprep.subr.bf16.mxu1 %v646_v0 }
  0x3a   :  { %504 = vmatpush3.bf16.msra.mxu0 %v503_v27 }
  0x3b   :  { %505 = vmatprep.subr.bf16.mxu0 %v646_v0 }
  0x3c   :  { %528 = vmatpush3.bf16.msra.mxu1 %v527_v36 }
  0x3d   :  { %529 = vmatprep.subr.bf16.mxu1 %v646_v0 }
  0x3e   :  { %507 = vmatpush3.bf16.msra.mxu0 %v506_v33 }
  0x3f   :  { %508 = vmatprep.subr.bf16.mxu0 %v646_v0 }
  0x40   :  { %531 = vmatpush3.bf16.msra.mxu1 %v530_v42 }
  0x41   :  { %532 = vmatprep.subr.bf16.mxu1 %v646_v0 }
  0x42   :  { %510 = vmatpush3.bf16.msra.mxu0 %v509_v39 }
  0x43   :  { %511 = vmatprep.subr.bf16.mxu0 %v646_v0 }
  0x44   :  { %534 = vmatpush3.bf16.msra.mxu1 %v533_v46 }
  0x45   :  { %535 = vmatprep.subr.bf16.mxu1 %v646_v0 }
  0x46   :  { %513 = vmatpush3.bf16.msra.mxu0 %v512_v45 }
  0x47   :  { %538 = vmatprep.subr.bf16.mxu0 %v646_v0 }
  0x48   :  { %537 = vmatpush3.bf16.msra.mxu1 %v536_v50 }
  0x49   :  { %418 = vmatmul.mubr.f32.vlgmr.msra.gmra.mrb[0].mxu0 %v38_v47 }
  0x4a   :  { %487 = vmatprep.mubr.msk.f32.mxu0 %vm647_vm0, %v648_v1  ;;  %540 = vmatpush3.bf16.msra.mxu0 %v539_v54  ;;  %v232_v1 = vld [vmem:[#allocation5 + $0x148] sm:$0xff] }
  0x4b   :  { %541 = vmatprep.subr.bf16.mxu0 %v646_v0  ;;  %v551_v2 = vpack.c.bf16 %v232_v1, %v231_v63 }
  0x4e   :  { %543 = vmatpush3.bf16.msra.mxu0 %v542_v56 }
  0x4f   :  { %544 = vmatprep.subr.bf16.mxu0 %v646_v0 }
  0x52   :  { %546 = vmatpush3.bf16.msra.mxu0 %v545_v59 }
  0x53   :  { %547 = vmatprep.subr.bf16.mxu0 %v646_v0 }
  0x56   :  { %549 = vmatpush3.bf16.msra.mxu0 %v548_v62 }
  0x57   :  { %550 = vmatprep.subr.bf16.mxu0 %v646_v0 }
  0x5a   :  { %552 = vmatpush3.bf16.msra.mxu0 %v551_v2 }
  0x5b   :  { %553 = vmatprep.subr.bf16.mxu0 %v646_v0 }
  0x5e   :  { %555 = vmatpush3.bf16.msra.mxu0 %v554_v5 }
  0x5f   :  { %556 = vmatprep.subr.bf16.mxu0 %v646_v0 }
  0x62   :  { %558 = vmatpush3.bf16.msra.mxu0 %v557_v8 }
  0x63   :  { %559 = vmatprep.subr.bf16.mxu0 %v646_v0 }
  0x66   :  { %561 = vmatpush3.bf16.msra.mxu0 %v560_v16 }
 0x11c   :  { %v126_v10 = vpop.f32.mrb[0].mxu0 }
 0x11d   :  { %v127_v11 = vadd.f32 %v331_v9, %v126_v10  ;;  %v419_v12 = vpop.f32.mrb[1].mxu0 }
 0x11f   :  { %v130_v13 = vmax.f32 %v127_v11, 0.0 }
 0x121   :  { %453 = vmatmul.mubr.f32.vlgmr.msra.gmra.mrb[0].mxu1 %v130_v13 }
 0x1f4   :  { %v218_v18 = vpop.f32.mrb[0].mxu1 }
 0x1f5   :  { %v219_v19 = vadd.f32 %v332_v17, %v218_v18  ;;  %v454_v20 = vpop.f32.mrb[1].mxu1 }
 0x1f7   :  { %v222_v21 = vmax.f32 %v219_v19, 0.0 }
 0x1f9   :  { %488 = vmatmul.mubr.f32.vlgmr.msra.gmra.mrb[2].mxu0 %v222_v21 }
 0x2cc   :  { %v310_v0 = vpop.f32.mrb[2].mxu0 }
 0x2cd   :  { %v311_v23 = vadd.f32 %v333_v22, %v310_v0  ;;  %v489_v24 = vpop.f32.mrb[3].mxu0 }
 0x2cf   :  { %314 = vst [vmem:[#allocation7] sm:$0xff] %v311_v23 }
 0x2d0   :  { %625 = shalt.err (!%p622_p6)
}
 0x2d1   :  { %s626_s10 = scalar_lea.hbm %s740_s2, 128 }
 0x2d2   :  { %p627_p7 = scmp.ne.s32.totalorder %s740_s2, %s626_s10  ;;  %p630_p8 = scmp.lt.u32.totalorder %s626_s10, %s740_s2 }
 0x2d4   :  { %p632_p9 = pnand %p630_p8, %p627_p7 }
 0x2d6   :  { %635 = shalt.err (!%p632_p9)
}
 0x2d7   :  { %324 = dma.vmem_to_hbm [thread:$0]  %s322_s6, 128, %s740_s2, [#allocation4]  }
 0x2d8   :  { %640 = dma.done.wait [#allocation4], 128  }
 0x2d9   :  { %641 = vsyncadd [#allocation4], 4294967168 }
 0x2da   :  { %328 = vsyncpa [#allocation3], 1 }
 0x2db   :  { %329 = vsyncpa [#allocation6], 1 }
 0x2dc   :  { %330 = vsyncpa [#allocation4], 1 }

</bundles_post_ra>
